<compile_context>
chip_gen: v7x
topology: tpu7x:2x2x1
jax: 0.10.0
libtpu: 0.0.40
codegen_flags: <defaults>
</compile_context>

<pallas_src>
import functools

import jax
import jax.numpy as jnp
import numpy as np
from jax.experimental import pallas as pl
from jax.experimental.pallas import tpu as pltpu


def inverted_residual_kernel(x_ref, w1_ref, b1_ref, wd_ref, bd_ref,
                             w2_ref, b2_ref, o_ref, *, h, m):
    # x_ref : (tn*h, W*C)   w1_ref: (W*C, W*M) = kron(I_W, w1)   b1_ref: (1, W*M)
    # wd_ref: (9, W*M) depthwise taps tiled over W                bd_ref: (1, W*M)
    # w2_ref: (W*M, W*C) = kron(I_W, w2)                          b2_ref: (1, W*C)
    wm = wd_ref.shape[1]                  # W * M lanes of the expanded layout
    tn = x_ref.shape[0] // h              # images in this block
    mm_dtype = w1_ref.dtype               # f32 or bf16 MXU operands

    xh = x_ref[...]                       # (tn*h, W*C) f32, dense block

    # ---- expansion 1x1 (C -> M) + ReLU6 : one lane-dense MXU matmul --------
    h1 = jnp.dot(xh.astype(mm_dtype), w1_ref[...],
                 preferred_element_type=jnp.float32) + b1_ref[0]
    h1 = jnp.clip(h1, 0.0, 6.0)           # (tn*h, W*M), lane index = j*M + m

    # ---- depthwise 3x3, stride 1, pad 1, groups = M, + ReLU6 ---------------
    # All 9 taps built in registers from shifted slices; zero borders are
    # inserted directly (no VMEM scratch, no zero-fill round trip).
    h3 = h1.reshape(tn, h, wm)            # leading-dim split only (free)
    zrow = jnp.zeros((tn, 1, wm), jnp.float32)
    rows = [
        jnp.concatenate([zrow, h3[:, :h - 1, :]], axis=1),   # input row i-1
        h3,                                                  # input row i
        jnp.concatenate([h3[:, 1:, :], zrow], axis=1),       # input row i+1
    ]
    zcol = jnp.zeros((tn, h, m), jnp.float32)
    wd = wd_ref[...]                      # (9, W*M), hoisted load
    acc = None
    for di in range(3):
        r = rows[di]
        taps = [
            jnp.concatenate([zcol, r[:, :, :wm - m]], axis=2),   # column j-1
            r,                                                   # column j
            jnp.concatenate([r[:, :, m:], zcol], axis=2),        # column j+1
        ]
        for dj in range(3):
            contrib = taps[dj] * wd[di * 3 + dj]
            acc = contrib if acc is None else acc + contrib      # init from tap 0
    acc = jnp.clip(acc + bd_ref[0], 0.0, 6.0)                    # (tn, h, W*M)

    # ---- projection 1x1 (M -> C), linear : one lane-dense MXU matmul -------
    acc2 = acc.reshape(tn * h, wm)
    out = jnp.dot(acc2.astype(mm_dtype), w2_ref[...],
                  preferred_element_type=jnp.float32) + b2_ref[0]

    # ---- residual add + dense (unmasked) store -----------------------------
    o_ref[...] = (out + xh).astype(o_ref.dtype)


@functools.partial(jax.jit, static_argnames=("tn", "matmul_dtype"))
def inverted_residual(x, params, *, tn=None, matmul_dtype=jnp.float32):
    """x: (B, D, H, W, C) float32.  Returns the same shape."""
    B, D, H, W, C = x.shape
    w1, b1, wd, bd, w2, b2 = params
    M = w1.shape[1]
    N = B * D
    WC, WM = W * C, W * M

    if tn is None:
        # largest divisor of N whose input block stays around ~1 MiB
        # (sized conservatively so double-buffered in/out blocks + weights fit
        #  comfortably inside v7x's smaller VMEM as well)
        budget = max(1, (1 << 20) // (H * W * C * 4))
        tn = max(d for d in range(1, N + 1) if N % d == 0 and d <= budget)
    assert N % tn == 0, "tn must divide B*D"

    # Dense (image*row, col*channel) view of the input -- contiguous DMAs.
    xh = x.reshape(N * H, WC)

    # Block-diagonal 1x1 weights (kron over W) so both pointwise convs run as
    # single matmuls directly on the (col, chan) lane layout.  Depthwise
    # weights/biases are pre-tiled over W to match the (j*M + m) lanes.
    # NOTE: kron-over-W keeps the MAC overhead at only W x the useful work;
    # for very wide feature maps, tile W as well.
    eye_w = jnp.eye(W, dtype=jnp.float32)
    w1b = jnp.kron(eye_w, w1).astype(matmul_dtype)        # (W*C, W*M)
    w2b = jnp.kron(eye_w, w2).astype(matmul_dtype)        # (W*M, W*C)
    b1t = jnp.tile(b1.reshape(1, M), (1, W))              # (1, W*M)
    bdt = jnp.tile(bd.reshape(1, M), (1, W))              # (1, W*M)
    wdt = jnp.tile(wd, (1, W))                            # (9, W*M)
    b2t = jnp.tile(b2.reshape(1, C), (1, W))              # (1, W*C)

    kernel = functools.partial(inverted_residual_kernel, h=H, m=M)

    flops = N * H * W * (4 * C * M + 18 * M + 2 * C)
    bytes_accessed = 2 * N * H * WC * 4 + 4 * (w1b.size + w2b.size + wdt.size)

    out = pl.pallas_call(
        kernel,
        out_shape=jax.ShapeDtypeStruct((N * H, WC), x.dtype),
        grid_spec=pltpu.PrefetchScalarGridSpec(
            num_scalar_prefetch=0,
            grid=(N // tn,),
            in_specs=[
                pl.BlockSpec((tn * H, WC), lambda n: (n, 0)),
                pl.BlockSpec((WC, WM), lambda n: (0, 0)),
                pl.BlockSpec((1, WM), lambda n: (0, 0)),
                pl.BlockSpec((9, WM), lambda n: (0, 0)),
                pl.BlockSpec((1, WM), lambda n: (0, 0)),
                pl.BlockSpec((WM, WC), lambda n: (0, 0)),
                pl.BlockSpec((1, WC), lambda n: (0, 0)),
            ],
            out_specs=pl.BlockSpec((tn * H, WC), lambda n: (n, 0)),
        ),
        compiler_params=pltpu.CompilerParams(
            dimension_semantics=("parallel",),      # batch axis -> megacore
            vmem_limit_bytes=32 * 1024 * 1024),
        input_output_aliases={0: 0},                # write the result over x
        cost_estimate=pl.CostEstimate(flops=flops, transcendentals=0,
                                      bytes_accessed=bytes_accessed),
    )(xh, w1b, b1t, wdt, bdt, w2b, b2t)
    return out.reshape(B, D, H, W, C)


def init_params(key, in_channels, expansion_factor=4):
    """Synthetic parameters matching the module's shapes:
       Conv1x1(C->M), depthwise Conv3x3(M, groups=M), Conv1x1(M->C)."""
    M = in_channels * expansion_factor
    ks = jax.random.split(key, 6)
    w1 = 0.1 * jax.random.normal(ks[0], (in_channels, M), jnp.float32)
    b1 = 0.1 * jax.random.normal(ks[1], (M,), jnp.float32)
    wd = 0.1 * jax.random.normal(ks[2], (9, M), jnp.float32)   # (kh*3+kw, M)
    bd = 0.1 * jax.random.normal(ks[3], (M,), jnp.float32)
    w2 = 0.1 * jax.random.normal(ks[4], (M, in_channels), jnp.float32)
    b2 = 0.1 * jax.random.normal(ks[5], (in_channels,), jnp.float32)
    return w1, b1, wd, bd, w2, b2


def reference(x, params):
    """Pure-JAX reference (channels-last math mirroring PyTorch semantics)."""
    B, D, H, W, C = x.shape
    w1, b1, wd, bd, w2, b2 = params
    xf = x.reshape(B * D, H, W, C)
    h = jnp.clip(jnp.einsum('nhwc,cm->nhwm', xf, w1) + b1, 0.0, 6.0)
    hp = jnp.pad(h, ((0, 0), (1, 1), (1, 1), (0, 0)))
    acc = jnp.zeros_like(h)
    for kh in range(3):
        for kw in range(3):
            acc = acc + hp[:, kh:kh + H, kw:kw + W, :] * wd[kh * 3 + kw]
    acc = jnp.clip(acc + bd, 0.0, 6.0)
    out = jnp.einsum('nhwm,mc->nhwc', acc, w2) + b2
    return (out + xf).reshape(B, D, H, W, C)


if __name__ == "__main__":
    B, D, H, W, C = 2, 4, 8, 8, 4
    expansion_factor = 4

    key = jax.random.PRNGKey(0)
    kx, kp = jax.random.split(key)
    x = jax.random.normal(kx, (B, D, H, W, C), jnp.float32)
    params = init_params(kp, C, expansion_factor)
    y_ref = reference(x, params)

    # f32 MXU operands; tn=4 of N=8 -> 2 grid steps to exercise the pipeline.
    y = jax.block_until_ready(inverted_residual(x, params, tn=4))
    np.testing.assert_allclose(np.asarray(y), np.asarray(y_ref),
                               rtol=1e-3, atol=1e-3)

    # bf16 MXU operands (f32 accumulation), auto tile size -- per review.
    y_bf16 = jax.block_until_ready(
        inverted_residual(x, params, matmul_dtype=jnp.bfloat16))
    np.testing.assert_allclose(np.asarray(y_bf16), np.asarray(y_ref),
                               rtol=2e-2, atol=2e-2)

    print("KERNEL_OK")
</pallas_src>

<mosaic_0001>
module attributes {stable_mosaic.version = 11 : i64} {
  func.func @inverted_residual_kernel(%arg0: i32, %arg1: memref<32x32xf32, #tpu.memory_space<vmem>>, %arg2: memref<32x128xf32, #tpu.memory_space<vmem>>, %arg3: memref<1x128xf32, #tpu.memory_space<vmem>>, %arg4: memref<9x128xf32, #tpu.memory_space<vmem>>, %arg5: memref<1x128xf32, #tpu.memory_space<vmem>>, %arg6: memref<128x32xf32, #tpu.memory_space<vmem>>, %arg7: memref<1x32xf32, #tpu.memory_space<vmem>>, %arg8: memref<32x32xf32, #tpu.memory_space<vmem>>) attributes {dimension_semantics = [#tpu.dimension_semantics<parallel>], iteration_bounds = array<i64: 2>, scalar_prefetch = 0 : i64, scratch_operands = 0 : i64, tpu.core_type = #tpu.core_type<tc>, window_params = [{transform_indices = @transform_0, window_bounds = array<i64: 32, 32>}, {pipeline_mode = #tpu.pipeline_mode<synchronous>, transform_indices = @transform_1, window_bounds = array<i64: 32, 128>}, {pipeline_mode = #tpu.pipeline_mode<synchronous>, transform_indices = @transform_2, window_bounds = array<i64: 1, 128>}, {pipeline_mode = #tpu.pipeline_mode<synchronous>, transform_indices = @transform_3, window_bounds = array<i64: 9, 128>}, {pipeline_mode = #tpu.pipeline_mode<synchronous>, transform_indices = @transform_4, window_bounds = array<i64: 1, 128>}, {pipeline_mode = #tpu.pipeline_mode<synchronous>, transform_indices = @transform_5, window_bounds = array<i64: 128, 32>}, {pipeline_mode = #tpu.pipeline_mode<synchronous>, transform_indices = @transform_6, window_bounds = array<i64: 1, 32>}, {transform_indices = @transform_7, window_bounds = array<i64: 32, 32>}]} {
    %c0 = arith.constant 0 : index
    %c0_0 = arith.constant 0 : index
    %0 = vector.load %arg1[%c0, %c0_0] : memref<32x32xf32, #tpu.memory_space<vmem>>, vector<32x32xf32>
    %c0_1 = arith.constant 0 : index
    %c0_2 = arith.constant 0 : index
    %1 = vector.load %arg2[%c0_1, %c0_2] : memref<32x128xf32, #tpu.memory_space<vmem>>, vector<32x128xf32>
    %cst = arith.constant dense<0.000000e+00> : vector<32x128xf32>
    %2 = tpu.matmul %0, %1, %cst {dimension_numbers = #tpu.dot_dimension_numbers<[1], [0], [0], [1], [0, 0, 1, 1], [], []>} : vector<32x32xf32>, vector<32x128xf32>, vector<32x128xf32> -> vector<32x128xf32>
    %c0_3 = arith.constant 0 : index
    %c0_4 = arith.constant 0 : index
    %3 = vector.load %arg3[%c0_3, %c0_4] : memref<1x128xf32, #tpu.memory_space<vmem>>, vector<1x128xf32>
    %4 = vector.shape_cast %3 : vector<1x128xf32> to vector<128xf32>
    %5 = vector.shape_cast %4 : vector<128xf32> to vector<1x128xf32>
    %6 = vector.broadcast %5 : vector<1x128xf32> to vector<32x128xf32>
    %7 = arith.addf %2, %6 : vector<32x128xf32>
    %cst_5 = arith.constant 0.000000e+00 : f32
    %cst_6 = arith.constant 6.000000e+00 : f32
    %8 = vector.broadcast %cst_5 : f32 to vector<32x128xf32>
    %9 = arith.maximumf %8, %7 : vector<32x128xf32>
    %10 = vector.broadcast %cst_6 : f32 to vector<32x128xf32>
    %11 = arith.minimumf %10, %9 : vector<32x128xf32>
    %12 = vector.shape_cast %11 : vector<32x128xf32> to vector<4x8x128xf32>
    %cst_7 = arith.constant 0.000000e+00 : f32
    %13 = vector.broadcast %cst_7 : f32 to vector<4x1x128xf32>
    %14 = vector.extract_strided_slice %12 {offsets = [0, 0, 0], sizes = [4, 7, 128], strides = [1, 1, 1]} : vector<4x8x128xf32> to vector<4x7x128xf32>
    %15 = tpu.concatenate %13, %14 in 1 : vector<4x1x128xf32>, vector<4x7x128xf32> -> vector<4x8x128xf32>
    %16 = vector.extract_strided_slice %12 {offsets = [0, 1, 0], sizes = [4, 7, 128], strides = [1, 1, 1]} : vector<4x8x128xf32> to vector<4x7x128xf32>
    %17 = tpu.concatenate %16, %13 in 1 : vector<4x7x128xf32>, vector<4x1x128xf32> -> vector<4x8x128xf32>
    %cst_8 = arith.constant 0.000000e+00 : f32
    %18 = vector.broadcast %cst_8 : f32 to vector<4x8x16xf32>
    %c0_9 = arith.constant 0 : index
    %c0_10 = arith.constant 0 : index
    %19 = vector.load %arg4[%c0_9, %c0_10] : memref<9x128xf32, #tpu.memory_space<vmem>>, vector<9x128xf32>
    %20 = vector.extract_strided_slice %15 {offsets = [0, 0, 0], sizes = [4, 8, 112], strides = [1, 1, 1]} : vector<4x8x128xf32> to vector<4x8x112xf32>
    %21 = tpu.concatenate %18, %20 in 2 : vector<4x8x16xf32>, vector<4x8x112xf32> -> vector<4x8x128xf32>
    %22 = vector.extract_strided_slice %15 {offsets = [0, 0, 16], sizes = [4, 8, 112], strides = [1, 1, 1]} : vector<4x8x128xf32> to vector<4x8x112xf32>
    %23 = tpu.concatenate %22, %18 in 2 : vector<4x8x112xf32>, vector<4x8x16xf32> -> vector<4x8x128xf32>
    %24 = vector.extract_strided_slice %19 {offsets = [0, 0], sizes = [1, 128], strides = [1, 1]} : vector<9x128xf32> to vector<1x128xf32>
    %25 = vector.shape_cast %24 : vector<1x128xf32> to vector<128xf32>
    %26 = vector.shape_cast %25 : vector<128xf32> to vector<1x1x128xf32>
    %27 = vector.broadcast %26 : vector<1x1x128xf32> to vector<4x8x128xf32>
    %28 = arith.mulf %21, %27 : vector<4x8x128xf32>
    %29 = vector.extract_strided_slice %19 {offsets = [1, 0], sizes = [1, 128], strides = [1, 1]} : vector<9x128xf32> to vector<1x128xf32>
    %30 = vector.shape_cast %29 : vector<1x128xf32> to vector<128xf32>
    %31 = vector.shape_cast %30 : vector<128xf32> to vector<1x1x128xf32>
    %32 = vector.broadcast %31 : vector<1x1x128xf32> to vector<4x8x128xf32>
    %33 = arith.mulf %15, %32 : vector<4x8x128xf32>
    %34 = arith.addf %28, %33 : vector<4x8x128xf32>
    %35 = vector.extract_strided_slice %19 {offsets = [2, 0], sizes = [1, 128], strides = [1, 1]} : vector<9x128xf32> to vector<1x128xf32>
    %36 = vector.shape_cast %35 : vector<1x128xf32> to vector<128xf32>
    %37 = vector.shape_cast %36 : vector<128xf32> to vector<1x1x128xf32>
    %38 = vector.broadcast %37 : vector<1x1x128xf32> to vector<4x8x128xf32>
    %39 = arith.mulf %23, %38 : vector<4x8x128xf32>
    %40 = arith.addf %34, %39 : vector<4x8x128xf32>
    %41 = vector.extract_strided_slice %12 {offsets = [0, 0, 0], sizes = [4, 8, 112], strides = [1, 1, 1]} : vector<4x8x128xf32> to vector<4x8x112xf32>
    %42 = tpu.concatenate %18, %41 in 2 : vector<4x8x16xf32>, vector<4x8x112xf32> -> vector<4x8x128xf32>
    %43 = vector.extract_strided_slice %12 {offsets = [0, 0, 16], sizes = [4, 8, 112], strides = [1, 1, 1]} : vector<4x8x128xf32> to vector<4x8x112xf32>
    %44 = tpu.concatenate %43, %18 in 2 : vector<4x8x112xf32>, vector<4x8x16xf32> -> vector<4x8x128xf32>
    %45 = vector.extract_strided_slice %19 {offsets = [3, 0], sizes = [1, 128], strides = [1, 1]} : vector<9x128xf32> to vector<1x128xf32>
    %46 = vector.shape_cast %45 : vector<1x128xf32> to vector<128xf32>
    %47 = vector.shape_cast %46 : vector<128xf32> to vector<1x1x128xf32>
    %48 = vector.broadcast %47 : vector<1x1x128xf32> to vector<4x8x128xf32>
    %49 = arith.mulf %42, %48 : vector<4x8x128xf32>
    %50 = arith.addf %40, %49 : vector<4x8x128xf32>
    %51 = vector.extract_strided_slice %19 {offsets = [4, 0], sizes = [1, 128], strides = [1, 1]} : vector<9x128xf32> to vector<1x128xf32>
    %52 = vector.shape_cast %51 : vector<1x128xf32> to vector<128xf32>
    %53 = vector.shape_cast %52 : vector<128xf32> to vector<1x1x128xf32>
    %54 = vector.broadcast %53 : vector<1x1x128xf32> to vector<4x8x128xf32>
    %55 = arith.mulf %12, %54 : vector<4x8x128xf32>
    %56 = arith.addf %50, %55 : vector<4x8x128xf32>
    %57 = vector.extract_strided_slice %19 {offsets = [5, 0], sizes = [1, 128], strides = [1, 1]} : vector<9x128xf32> to vector<1x128xf32>
    %58 = vector.shape_cast %57 : vector<1x128xf32> to vector<128xf32>
    %59 = vector.shape_cast %58 : vector<128xf32> to vector<1x1x128xf32>
    %60 = vector.broadcast %59 : vector<1x1x128xf32> to vector<4x8x128xf32>
    %61 = arith.mulf %44, %60 : vector<4x8x128xf32>
    %62 = arith.addf %56, %61 : vector<4x8x128xf32>
    %63 = vector.extract_strided_slice %17 {offsets = [0, 0, 0], sizes = [4, 8, 112], strides = [1, 1, 1]} : vector<4x8x128xf32> to vector<4x8x112xf32>
    %64 = tpu.concatenate %18, %63 in 2 : vector<4x8x16xf32>, vector<4x8x112xf32> -> vector<4x8x128xf32>
    %65 = vector.extract_strided_slice %17 {offsets = [0, 0, 16], sizes = [4, 8, 112], strides = [1, 1, 1]} : vector<4x8x128xf32> to vector<4x8x112xf32>
    %66 = tpu.concatenate %65, %18 in 2 : vector<4x8x112xf32>, vector<4x8x16xf32> -> vector<4x8x128xf32>
    %67 = vector.extract_strided_slice %19 {offsets = [6, 0], sizes = [1, 128], strides = [1, 1]} : vector<9x128xf32> to vector<1x128xf32>
    %68 = vector.shape_cast %67 : vector<1x128xf32> to vector<128xf32>
    %69 = vector.shape_cast %68 : vector<128xf32> to vector<1x1x128xf32>
    %70 = vector.broadcast %69 : vector<1x1x128xf32> to vector<4x8x128xf32>
    %71 = arith.mulf %64, %70 : vector<4x8x128xf32>
    %72 = arith.addf %62, %71 : vector<4x8x128xf32>
    %73 = vector.extract_strided_slice %19 {offsets = [7, 0], sizes = [1, 128], strides = [1, 1]} : vector<9x128xf32> to vector<1x128xf32>
    %74 = vector.shape_cast %73 : vector<1x128xf32> to vector<128xf32>
    %75 = vector.shape_cast %74 : vector<128xf32> to vector<1x1x128xf32>
    %76 = vector.broadcast %75 : vector<1x1x128xf32> to vector<4x8x128xf32>
    %77 = arith.mulf %17, %76 : vector<4x8x128xf32>
    %78 = arith.addf %72, %77 : vector<4x8x128xf32>
    %79 = vector.extract_strided_slice %19 {offsets = [8, 0], sizes = [1, 128], strides = [1, 1]} : vector<9x128xf32> to vector<1x128xf32>
    %80 = vector.shape_cast %79 : vector<1x128xf32> to vector<128xf32>
    %81 = vector.shape_cast %80 : vector<128xf32> to vector<1x1x128xf32>
    %82 = vector.broadcast %81 : vector<1x1x128xf32> to vector<4x8x128xf32>
    %83 = arith.mulf %66, %82 : vector<4x8x128xf32>
    %84 = arith.addf %78, %83 : vector<4x8x128xf32>
    %c0_11 = arith.constant 0 : index
    %c0_12 = arith.constant 0 : index
    %85 = vector.load %arg5[%c0_11, %c0_12] : memref<1x128xf32, #tpu.memory_space<vmem>>, vector<1x128xf32>
    %86 = vector.shape_cast %85 : vector<1x128xf32> to vector<128xf32>
    %87 = vector.shape_cast %86 : vector<128xf32> to vector<1x1x128xf32>
    %88 = vector.broadcast %87 : vector<1x1x128xf32> to vector<4x8x128xf32>
    %89 = arith.addf %84, %88 : vector<4x8x128xf32>
    %cst_13 = arith.constant 0.000000e+00 : f32
    %cst_14 = arith.constant 6.000000e+00 : f32
    %90 = vector.broadcast %cst_13 : f32 to vector<4x8x128xf32>
    %91 = arith.maximumf %90, %89 : vector<4x8x128xf32>
    %92 = vector.broadcast %cst_14 : f32 to vector<4x8x128xf32>
    %93 = arith.minimumf %92, %91 : vector<4x8x128xf32>
    %94 = vector.shape_cast %93 : vector<4x8x128xf32> to vector<32x128xf32>
    %c0_15 = arith.constant 0 : index
    %c0_16 = arith.constant 0 : index
    %95 = vector.load %arg6[%c0_15, %c0_16] : memref<128x32xf32, #tpu.memory_space<vmem>>, vector<128x32xf32>
    %cst_17 = arith.constant dense<0.000000e+00> : vector<32x32xf32>
    %96 = tpu.matmul %94, %95, %cst_17 {dimension_numbers = #tpu.dot_dimension_numbers<[1], [0], [0], [1], [0, 0, 1, 1], [], []>} : vector<32x128xf32>, vector<128x32xf32>, vector<32x32xf32> -> vector<32x32xf32>
    %c0_18 = arith.constant 0 : index
    %c0_19 = arith.constant 0 : index
    %97 = vector.load %arg7[%c0_18, %c0_19] : memref<1x32xf32, #tpu.memory_space<vmem>>, vector<1x32xf32>
    %98 = vector.shape_cast %97 : vector<1x32xf32> to vector<32xf32>
    %99 = vector.shape_cast %98 : vector<32xf32> to vector<1x32xf32>
    %100 = vector.broadcast %99 : vector<1x32xf32> to vector<32x32xf32>
    %101 = arith.addf %96, %100 : vector<32x32xf32>
    %102 = arith.addf %101, %0 : vector<32x32xf32>
    %c0_20 = arith.constant 0 : index
    %c0_21 = arith.constant 0 : index
    %103 = vector.load %arg8[%c0_20, %c0_21] : memref<32x32xf32, #tpu.memory_space<vmem>>, vector<32x32xf32>
    tpu.vector_store %arg8[%c0_20, %c0_21], %102 {strides = array<i32>} : memref<32x32xf32, #tpu.memory_space<vmem>>, vector<32x32xf32>,
    return
  }
  func.func @transform_0(%arg0: i32) -> (i32, i32) {
    %c0_i32 = arith.constant 0 : i32
    %c0_i32_0 = arith.constant 0 : i32
    return %arg0, %c0_i32 : i32, i32
  }
  func.func @transform_1(%arg0: i32) -> (i32, i32) {
    %c0_i32 = arith.constant 0 : i32
    %c0_i32_0 = arith.constant 0 : i32
    %c0_i32_1 = arith.constant 0 : i32
    return %c0_i32, %c0_i32_0 : i32, i32
  }
  func.func @transform_2(%arg0: i32) -> (i32, i32) {
    %c0_i32 = arith.constant 0 : i32
    %c0_i32_0 = arith.constant 0 : i32
    %c0_i32_1 = arith.constant 0 : i32
    return %c0_i32, %c0_i32_0 : i32, i32
  }
  func.func @transform_3(%arg0: i32) -> (i32, i32) {
    %c0_i32 = arith.constant 0 : i32
    %c0_i32_0 = arith.constant 0 : i32
    %c0_i32_1 = arith.constant 0 : i32
    return %c0_i32, %c0_i32_0 : i32, i32
  }
  func.func @transform_4(%arg0: i32) -> (i32, i32) {
    %c0_i32 = arith.constant 0 : i32
    %c0_i32_0 = arith.constant 0 : i32
    %c0_i32_1 = arith.constant 0 : i32
    return %c0_i32, %c0_i32_0 : i32, i32
  }
  func.func @transform_5(%arg0: i32) -> (i32, i32) {
    %c0_i32 = arith.constant 0 : i32
    %c0_i32_0 = arith.constant 0 : i32
    %c0_i32_1 = arith.constant 0 : i32
    return %c0_i32, %c0_i32_0 : i32, i32
  }
  func.func @transform_6(%arg0: i32) -> (i32, i32) {
    %c0_i32 = arith.constant 0 : i32
    %c0_i32_0 = arith.constant 0 : i32
    %c0_i32_1 = arith.constant 0 : i32
    return %c0_i32, %c0_i32_0 : i32, i32
  }
  func.func @transform_7(%arg0: i32) -> (i32, i32) {
    %c0_i32 = arith.constant 0 : i32
    %c0_i32_0 = arith.constant 0 : i32
    return %arg0, %c0_i32 : i32, i32
  }
}

</mosaic_0001>

<bundles_post_ra>
// kernel: tile.29
= control target key start
LH: loop header
LB: loop body
LE: loop exit
PB: predicated region body
PF: predicated region fallthrough
CT: control target
= control target key end

     0   :  { %vm4_vm0 = vcmask 1047556   ;;  %s169_s14 = smov 96   ;;  %s170_s15 = smov 112   ;;  %vm6_vm1 = vcmask 130048   ;;  %vm21_vm2 = vcmask 1048448   ;;  %vm38_vm3 = vcmask 917248   ;;  %s314_s0 = inlined_call_operand.vmem [shape: f32[9,8,16], index: 0, kind: input, shape index: {}]   ;;  %s315_s1 = inlined_call_operand.vmem [shape: f32[9,128], index: 1, kind: output, shape index: {}]  }
   0x1   :  { %v138_v0 = vld [vmem:[%s314_s0 + $0x6] ss:$8 sm:$0xf]   ;;  %v134_v3 = vld [vmem:[%s314_s0 + $0x7] ss:$8 sm:$0xf]  }
   0x2   :  { %v139_v1 = vld [vmem:[%s314_s0 + $0x6] ss:$8 sm:$0xf0]   ;;  %v135_v4 = vld [vmem:[%s314_s0 + $0x7] ss:$8 sm:$0xf0]  }
   0x3   :  { %v35_v2 = vsel %vm4_vm0, %v139_v1, %v138_v0  ;;  %v18_v5 = vsel %vm4_vm0, %v135_v4, %v134_v3  ;;  %v140_v6 = vld [vmem:[%s314_s0 + $0x46] sm:$0x1]   ;;  %v136_v7 = vld [vmem:[%s314_s0 + $0x47] sm:$0x1]   ;;  %v144_v10 = vld [vmem:[%s314_s0 + $0x45] sm:$0x1]  }
   0x4   :  { %36 = vrot.lane.b32.xlu1 %v35_v2, %s169_s14  ;;  %19 = vrot.lane.b32.xlu0 %v18_v5, %s170_s15  ;;  %v142_v8 = vld [vmem:[%s314_s0 + $0x5] ss:$8 sm:$0xf]   ;;  %v146_v12 = vld [vmem:[%s314_s0 + $0x4] ss:$8 sm:$0xf]  }
   0x5   :  { %v143_v9 = vld [vmem:[%s314_s0 + $0x5] ss:$8 sm:$0xf0]   ;;  %v147_v13 = vld [vmem:[%s314_s0 + $0x4] ss:$8 sm:$0xf0]  }
   0x6   :  { %v52_v11 = vsel %vm4_vm0, %v143_v9, %v142_v8  ;;  %s171_s30 = smov 80   ;;  %v148_v14 = vld [vmem:[%s314_s0 + $0x44] sm:$0x1]   ;;  %v2_v15 = vld [vmem:[%s314_s0] ss:$8 sm:$0xf]   ;;  %v69_v18 = vsel %vm4_vm0, %v147_v13, %v146_v12 }
   0x7   :  { %v3_v16 = vld [vmem:[%s314_s0] ss:$8 sm:$0xf0]   ;;  %v150_v20 = vld [vmem:[%s314_s0 + $0x3] ss:$8 sm:$0xf]  }
   0x8   :  { %42 = vrot.lane.b32.xlu1 %v140_v6, %s169_s14  ;;  %25 = vrot.lane.b32.xlu0 %v136_v7, %s170_s15  ;;  %v132_v17 = vld [vmem:[%s314_s0 + $0x40] sm:$0x1]   ;;  %v5_v19 = vsel %vm4_vm0, %v3_v16, %v2_v15  ;;  %v151_v21 = vld [vmem:[%s314_s0 + $0x3] ss:$8 sm:$0xf0]   ;;  %s172_s18 = smov 64  }
   0x9   :  { %133 = vst.msk [vmem:[%s315_s1 + $0x8] sm:$0x1] %vm6_vm1, %v132_v17   ;;  %7 = vst.msk [vmem:[%s315_s1] sm:$0xff] %vm6_vm1, %v5_v19   ;;  %v152_v22 = vld [vmem:[%s314_s0 + $0x43] sm:$0x1]   ;;  %v86_v23 = vsel %vm4_vm0, %v151_v21, %v150_v20  ;;  %s173_s25 = smov 48  }
   0xa   :  { %v154_v24 = vld [vmem:[%s314_s0 + $0x2] ss:$8 sm:$0xf]   ;;  %v158_v28 = vld [vmem:[%s314_s0 + $0x1] ss:$8 sm:$0xf]  }
   0xb   :  { %v155_v25 = vld [vmem:[%s314_s0 + $0x2] ss:$8 sm:$0xf0]   ;;  %v159_v29 = vld [vmem:[%s314_s0 + $0x1] ss:$8 sm:$0xf0]  }
   0xc   :  { %59 = vrot.lane.b32.xlu1 %v144_v10, %s171_s30  ;;  %53 = vrot.lane.b32.xlu0 %v52_v11, %s171_s30  ;;  %v156_v26 = vld [vmem:[%s314_s0 + $0x42] sm:$0x1]   ;;  %v103_v27 = vsel %vm4_vm0, %v155_v25, %v154_v24  ;;  %s174_s3 = smov 32   ;;  %v160_v30 = vld [vmem:[%s314_s0 + $0x41] sm:$0x1]   ;;  %v120_v31 = vsel %vm4_vm0, %v159_v29, %v158_v28  ;;  %s175_s0 = smov 16  }
   0xd   :  { %vm55_vm4 = vcmask 786048   ;;  %vm72_vm5 = vcmask 654848   ;;  %vm89_vm6 = vcmask 523648   ;;  %vm106_vm7 = vcmask 392448  }
   0xe   :  { %vm123_vm8 = vcmask 261248  }
  0x10   :  { %76 = vrot.lane.b32.xlu1 %v148_v14, %s172_s18  ;;  %70 = vrot.lane.b32.xlu0 %v69_v18, %s172_s18 }
  0x14   :  { %93 = vrot.lane.b32.xlu1 %v152_v22, %s173_s25  ;;  %87 = vrot.lane.b32.xlu0 %v86_v23, %s173_s25 }
  0x18   :  { %110 = vrot.lane.b32.xlu1 %v156_v26, %s174_s3  ;;  %104 = vrot.lane.b32.xlu0 %v103_v27, %s174_s3 }
  0x1c   :  { %127 = vrot.lane.b32.xlu1 %v160_v30, %s175_s0  ;;  %121 = vrot.lane.b32.xlu0 %v120_v31, %s175_s0 }
  0x76   :  { %v37_v32 = vpop.permute.xlu1 %36   ;;  %v20_v33 = vpop.permute.xlu0 %19  }
  0x77   :  { %22 = vst.msk [vmem:[%s315_s1] sm:$0xff] %vm21_vm2, %v20_v33  }
  0x78   :  { %39 = vst.msk [vmem:[%s315_s1] sm:$0xff] %vm38_vm3, %v37_v32  }
  0x7a   :  { %v43_v34 = vpop.permute.xlu1 %42   ;;  %v26_v35 = vpop.permute.xlu0 %25  }
  0x7b   :  { %137 = vst.msk [vmem:[%s315_s1 + $0x8] sm:$0x1] %vm21_vm2, %v26_v35  }
  0x7c   :  { %141 = vst.msk [vmem:[%s315_s1 + $0x8] sm:$0x1] %vm38_vm3, %v43_v34  }
  0x7e   :  { %v60_v36 = vpop.permute.xlu1 %59   ;;  %v54_v37 = vpop.permute.xlu0 %53  }
  0x7f   :  { %145 = vst.msk [vmem:[%s315_s1 + $0x8] sm:$0x1] %vm55_vm4, %v60_v36   ;;  %56 = vst.msk [vmem:[%s315_s1] sm:$0xff] %vm55_vm4, %v54_v37  }
  0x82   :  { %v77_v38 = vpop.permute.xlu1 %76   ;;  %v71_v39 = vpop.permute.xlu0 %70  }
  0x83   :  { %149 = vst.msk [vmem:[%s315_s1 + $0x8] sm:$0x1] %vm72_vm5, %v77_v38   ;;  %73 = vst.msk [vmem:[%s315_s1] sm:$0xff] %vm72_vm5, %v71_v39  }
  0x86   :  { %v94_v40 = vpop.permute.xlu1 %93   ;;  %v88_v41 = vpop.permute.xlu0 %87  }
  0x87   :  { %153 = vst.msk [vmem:[%s315_s1 + $0x8] sm:$0x1] %vm89_vm6, %v94_v40   ;;  %90 = vst.msk [vmem:[%s315_s1] sm:$0xff] %vm89_vm6, %v88_v41  }
  0x8a   :  { %v111_v42 = vpop.permute.xlu1 %110   ;;  %v105_v43 = vpop.permute.xlu0 %104  }
  0x8b   :  { %157 = vst.msk [vmem:[%s315_s1 + $0x8] sm:$0x1] %vm106_vm7, %v111_v42   ;;  %107 = vst.msk [vmem:[%s315_s1] sm:$0xff] %vm106_vm7, %v105_v43  }
  0x8e   :  { %v128_v44 = vpop.permute.xlu1 %127   ;;  %v122_v45 = vpop.permute.xlu0 %121  }
  0x8f   :  { %161 = vst.msk [vmem:[%s315_s1 + $0x8] sm:$0x1] %vm123_vm8, %v128_v44   ;;  %124 = vst.msk [vmem:[%s315_s1] sm:$0xff] %vm123_vm8, %v122_v45  }

// kernel: inverted_residual.1
= control target key start
LH: loop header
LB: loop body
LE: loop exit
PB: predicated region body
PF: predicated region fallthrough
CT: control target
= control target key end

     0   :  { %s1035_s24 = smov 0   ;;  %s1330_s0 = inlined_call_operand.vmem [shape: f32[64,32], index: 0, kind: input, shape index: {}, may-alias: {0,7}]   ;;  %s1331_s1 = inlined_call_operand.vmem [shape: f32[32,128], index: 1, kind: input, shape index: {}]   ;;  %s1332_s2 = inlined_call_operand.vmem [shape: f32[1,128], index: 2, kind: input, shape index: {}]   ;;  %s1333_s3 = inlined_call_operand.vmem [shape: f32[9,128], index: 3, kind: input, shape index: {}]   ;;  %s1334_s4 = inlined_call_operand.vmem [shape: f32[1,128], index: 4, kind: input, shape index: {}]   ;;  %s1335_s5 = inlined_call_operand.vmem [shape: f32[128,32], index: 5, kind: input, shape index: {}]   ;;  %s1336_s6 = inlined_call_operand.vmem [shape: f32[1,32], index: 6, kind: input, shape index: {}]   ;;  %s1337_s7 = inlined_call_operand.vmem [shape: f32[64,32], index: 7, kind: output, shape index: {}, may-alias: {0,7}]  }
   0x1 LB: > { %s836_s25 = sadd.s32 4294967295, %s991_s24   ;;  %p840_p0 = scmp.ge.s32.totalorder %s991_s24, 1  ;;  %s991_s24 = sphi %s1035_s24, %s17_s24  }
   0x2   : > { %p238_p1 = scmp.lt.s32.totalorder %s991_s24, 3 }
   0x4   : > { %p239_p2 = pnand %p840_p0, %p238_p1 }
   0x5   : > { %v286_v0 = vld [vmem:[%s1331_s1] sm:$0xff] (!%p239_p2)  ;;  %v287_v1 = vld [vmem:[%s1331_s1 + $0x8] sm:$0xff] (!%p239_p2)  ;;  %v288_v2 = vld [vmem:[%s1331_s1 + $0x10] sm:$0xff] (!%p239_p2)  ;;  %s841_s9 = sshll.u32 (!%p239_p2), %s836_s25, 2  ;;  %vm297_vm0 = vcmask (!%p239_p2), 261120   ;;  %vm415_vm1 = vcmask (!%p239_p2), 1040384  }
   0x6   : > { %242 = sbr.rel (%p239_p2) target bundleno = 628 (0x274), region = 48  ;;  %v935_v3 = vpack.c.bf16 (!%p239_p2), %v287_v1, %v286_v0  ;;  %v289_v4 = vld [vmem:[%s1331_s1 + $0x18] sm:$0xff] (!%p239_p2)  ;;  %p271_p3 = scmp.lt.s32.totalorder (!%p239_p2), %s841_s9, 7  ;;  %v845_v10 = vld [vmem:[%s1332_s2] ss:$0 sm:$0xff] (!%p239_p2)  ;;  %v665_v27 = vld [vmem:[%s1335_s5 + $0x8] sm:$0xff] (!%p239_p2) }
   0x7   : > { %v939_v5 = vpack.c.bf16 (!%p239_p2), %v289_v4, %v288_v2  ;;  %s993_s18 = smov (!%p239_p2), 16   ;;  %s994_s19 = smov (!%p239_p2), 112   ;;  %v664_v26 = vld [vmem:[%s1335_s5] sm:$0xff] (!%p239_p2)  ;;  %vm428_vm2 = vcmask (!%p239_p2), 1046528   ;;  %v666_v34 = vld [vmem:[%s1335_s5 + $0x10] sm:$0xff] (!%p239_p2)  ;;  %v667_v35 = vld [vmem:[%s1335_s5 + $0x18] sm:$0xff] (!%p239_p2) }
   0x8   : > { %936 = vmatprep.subr.bf16.mxu0 (!%p239_p2), %v935_v3  ;;  %v943_v29 = vpack.c.bf16 (!%p239_p2), %v665_v27, %v664_v26  ;;  %v947_v37 = vpack.c.bf16 (!%p239_p2), %v667_v35, %v666_v34  ;;  %v668_v40 = vld [vmem:[%s1335_s5 + $0x20] sm:$0xff] (!%p239_p2)  ;;  %v669_v41 = vld [vmem:[%s1335_s5 + $0x28] sm:$0xff] (!%p239_p2)  ;;  %v670_v44 = vld [vmem:[%s1335_s5 + $0x30] sm:$0xff] (!%p239_p2)  ;;  %vm451_vm3 = vcmask (!%p239_p2), 130048   ;;  %vm468_vm4 = vcmask (!%p239_p2), 916480  }
   0x9   : > { %938 = vmatpush3.bf16.msra.mxu0 (!%p239_p2), %v935_v3  ;;  %v951_v42 = vpack.c.bf16 (!%p239_p2), %v669_v41, %v668_v40  ;;  %v671_v45 = vld [vmem:[%s1335_s5 + $0x38] sm:$0xff] (!%p239_p2)  ;;  %v672_v48 = vld [vmem:[%s1335_s5 + $0x40] sm:$0xff] (!%p239_p2)  ;;  %v673_v49 = vld [vmem:[%s1335_s5 + $0x48] sm:$0xff] (!%p239_p2)  ;;  %v473_v3 = vlaneseq (!%p239_p2) }
   0xa   : > { %940 = vmatprep.subr.bf16.mxu0 (!%p239_p2), %v939_v5  ;;  %944 = vmatprep.subr.bf16.mxu1 (!%p239_p2), %v943_v29  ;;  %v955_v47 = vpack.c.bf16 (!%p239_p2), %v671_v45, %v670_v44  ;;  %v959_v52 = vpack.c.bf16 (!%p239_p2), %v673_v49, %v672_v48  ;;  %v674_v53 = vld [vmem:[%s1335_s5 + $0x50] sm:$0xff] (!%p239_p2)  ;;  %v675_v54 = vld [vmem:[%s1335_s5 + $0x58] sm:$0xff] (!%p239_p2)  ;;  %v676_v57 = vld [vmem:[%s1335_s5 + $0x60] sm:$0xff] (!%p239_p2) }
   0xb   : > { %946 = vmatpush3.bf16.msra.mxu1 (!%p239_p2), %v943_v29  ;;  %v963_v56 = vpack.c.bf16 (!%p239_p2), %v675_v54, %v674_v53  ;;  %v677_v58 = vld [vmem:[%s1335_s5 + $0x68] sm:$0xff] (!%p239_p2)  ;;  %v678_v61 = vld [vmem:[%s1335_s5 + $0x70] sm:$0xff] (!%p239_p2)  ;;  %v679_v62 = vld [vmem:[%s1335_s5 + $0x78] sm:$0xff] (!%p239_p2) }
   0xc   : > { %948 = vmatprep.subr.bf16.mxu1 (!%p239_p2), %v947_v37  ;;  %v967_v60 = vpack.c.bf16 (!%p239_p2), %v677_v58, %v676_v57  ;;  %v971_v1 = vpack.c.bf16 (!%p239_p2), %v679_v62, %v678_v61 }
   0xd   : > { %s1339_s9 = smov (!%p271_p3, %s841_s9), 7  ;;  %942 = vmatpush3.bf16.msra.mxu0 %v939_v5 }
   0xe   : > { %s842_s12 = sshll.u32 %s1339_s9, 3 }
   0xf   : > { %s274_s15 = scalar_lea.vmem %s1330_s0, %s842_s12  ;;  %950 = vmatpush3.bf16.msra.mxu1 %v947_v37  ;;  %s280_s25 = scalar_lea.vmem %s1337_s7, %s842_s12 }
  0x10   : > { %v1063_v6 = vld [vmem:[%s274_s15] sm:$0xff]  ;;  %v1067_v7 = vld [vmem:[%s274_s15 + $0x8] sm:$0xff]  ;;  %v1069_v8 = vld [vmem:[%s274_s15 + $0x10] sm:$0xff]  ;;  %952 = vmatprep.subr.bf16.mxu1 %v951_v42 }
  0x11   : > { %891 = vmatprep.mubr.msk.f32.mxu0 %vm297_vm0, %v1063_v6  ;;  %v1075_v9 = vld [vmem:[%s274_s15 + $0x18] sm:$0xff] }
  0x12   : > { %892 = vmatmul.mubr.msk.f32.vlgmr.msra.gmra.mrb[0].mxu0 %vm297_vm0, %v1067_v7 }
  0x13   : > { %894 = vmatprep.mubr.msk.f32.mxu0 %vm297_vm0, %v1069_v8  ;;  %954 = vmatpush3.bf16.msra.mxu1 %v951_v42 }
  0x14   : > { %956 = vmatprep.subr.bf16.mxu1 %v955_v47 }
  0x16   : > { %895 = vmatmul.mubr.msk.f32.gmra.mrb[2].mxu0 %vm297_vm0, %v1075_v9 }
  0x17   : > { %958 = vmatpush3.bf16.msra.mxu1 %v955_v47 }
  0x18   : > { %960 = vmatprep.subr.bf16.mxu1 %v959_v52 }
  0x1b   : > { %962 = vmatpush3.bf16.msra.mxu1 %v959_v52 }
  0x1c   : > { %964 = vmatprep.subr.bf16.mxu1 %v963_v56 }
  0x1f   : > { %966 = vmatpush3.bf16.msra.mxu1 %v963_v56 }
  0x20   : > { %968 = vmatprep.subr.bf16.mxu1 %v967_v60 }
  0x23   : > { %970 = vmatpush3.bf16.msra.mxu1 %v967_v60 }
  0x24   : > { %972 = vmatprep.subr.bf16.mxu1 %v971_v1 }
  0x27   : > { %974 = vmatpush3.bf16.msra.mxu1 %v971_v1 }
  0xe5   : > { %v893_v11 = vpop.f32.mrb[0].mxu0 }
  0xe6   : > { %v382_v12 = vadd.f32 %v893_v11, %v845_v10  ;;  %v376_v13 = vpop.f32.mrb[1].mxu0 }
  0xe7   : > { %v377_v14 = vadd.f32 %v845_v10, %v376_v13 }
  0xe8   : > { %v396_v15 = vmax.f32 %v382_v12, 0.0 }
  0xe9   : > { %v395_v16 = vmax.f32 %v377_v14, 0.0  ;;  %v896_v17 = vpop.f32.mrb[2].mxu0 }
  0xea   : > { %v1082_v18 = vmin.f32 %v396_v15, 6.0  ;;  %v386_v19 = vpop.f32.mrb[3].mxu0  ;;  %v392_v21 = vadd.f32 %v896_v17, %v845_v10 }
  0xeb   : > { %v1084_v20 = vmin.f32 %v395_v16, 6.0  ;;  %v387_v31 = vadd.f32 %v845_v10, %v386_v19  ;;  %v474_v10 = vshrl.u32 %v473_v3, 7  ;;  %v433_v16 = vld [vmem:[%s1333_s3] sm:$0xff] }
  0xec   : > { %507 = vrot.lane.b32.xlu1 %v1082_v18, %s993_s18  ;;  %v408_v22 = vrot.slane %v1082_v18, 7  ;;  %v398_v25 = vmax.f32 %v392_v21, 0.0  ;;  %v421_v38 = vrot.slane %v1082_v18, 1 }
  0xed   : > { %v407_v24 = vrot.slane %v1084_v20, 7  ;;  %v420_v32 = vrot.slane %v1084_v20, 1  ;;  %v397_v33 = vmax.f32 %v387_v31, 0.0  ;;  %v475_v12 = vsub.s32 0, %v474_v10 }
  0xee   : > { %v1090_v23 = vsel %vm415_vm1, 0.0, %v408_v22  ;;  %v1106_v30 = vmin.f32 %v398_v25, 6.0  ;;  %v1142_v43 = vsel %vm428_vm2, %v421_v38, 0.0  ;;  %v483_v14 = vsub.s32 1, %v474_v10 }
  0xef   : > { %441 = vrot.lane.b32.xlu0 %v1090_v23, %s993_s18  ;;  %v1104_v28 = vsel %vm415_vm1, 0.0, %v407_v24  ;;  %v1124_v36 = vsel %vm428_vm2, %v420_v32, 0.0  ;;  %v1131_v39 = vmin.f32 %v397_v33, 6.0  ;;  %v1221_v17 = vrot.slane %v433_v16, %v475_v12 }
  0xf0   : > { %523 = vrot.lane.b32.xlu1 %v1082_v18, %s994_s19  ;;  %v410_v46 = vrot.slane %v1106_v30, 7  ;;  %v423_v59 = vrot.slane %v1106_v30, 1  ;;  %v495_v19 = vsub.s32 2, %v474_v10  ;;  %v1224_v24 = vrot.slane %v433_v16, %v483_v14 }
  0xf1   : > { %v409_v51 = vrot.slane %v1131_v39, 7  ;;  %v422_v0 = vrot.slane %v1131_v39, 1  ;;  %v539_v25 = vsub.s32 3, %v474_v10  ;;  %v551_v31 = vsub.s32 4, %v474_v10 }
  0xf2   : > { %v1164_v50 = vsel %vm415_vm1, 0.0, %v410_v46  ;;  %v1202_v63 = vsel %vm428_vm2, %v423_v59, 0.0  ;;  %v1227_v29 = vrot.slane %v433_v16, %v495_v19  ;;  %v486_v33 = vmul.f32 %v1224_v24, %v1090_v23 }
  0xf3   : > { %439 = vrot.lane.b32.xlu0 %v1104_v28, %s993_s18  ;;  %v1178_v55 = vsel %vm415_vm1, 0.0, %v409_v51  ;;  %v1210_v2 = vsel %vm428_vm2, %v422_v0, 0.0  ;;  %v1231_v34 = vrot.slane %v433_v16, %v539_v25  ;;  %v563_v35 = vsub.s32 5, %v474_v10 }
  0xf4   : > { %505 = vrot.lane.b32.xlu1 %v1084_v20, %s993_s18  ;;  %v1236_v44 = vrot.slane %v433_v16, %v551_v31  ;;  %v623_v45 = vsub.s32 7, %v474_v10  ;;  %v611_v49 = vsub.s32 6, %v474_v10  ;;  %v485_v61 = vmul.f32 %v1224_v24, %v1104_v28 }
  0xf5   : > { %v1240_v48 = vrot.slane %v433_v16, %v563_v35 }
  0xf6   : > { %v554_v57 = vmul.f32 %v1236_v44, %v1082_v18  ;;  %v1246_v58 = vrot.slane %v433_v16, %v623_v45  ;;  %v1252_v0 = vrot.slane %v433_v16, %v611_v49 }
  0xf7   : > { %511 = vrot.lane.b32.xlu0 %v1106_v30, %s993_s18 }
  0xf8   : > { %521 = vrot.lane.b32.xlu1 %v1084_v20, %s994_s19 }
  0xfb   : > { %577 = vrot.lane.b32.xlu0 %v1124_v36, %s993_s18 }
  0xfc   : > { %458 = vrot.lane.b32.xlu1 %v1090_v23, %s994_s19 }
  0xff   : > { %509 = vrot.lane.b32.xlu0 %v1131_v39, %s993_s18 }
 0x100   : > { %579 = vrot.lane.b32.xlu1 %v1142_v43, %s993_s18 }
 0x103   : > { %525 = vrot.lane.b32.xlu0 %v1131_v39, %s994_s19 }
 0x104   : > { %456 = vrot.lane.b32.xlu1 %v1104_v28, %s994_s19 }
 0x107   : > { %445 = vrot.lane.b32.xlu0 %v1164_v50, %s993_s18 }
 0x108   : > { %527 = vrot.lane.b32.xlu1 %v1106_v30, %s994_s19 }
 0x10b   : > { %443 = vrot.lane.b32.xlu0 %v1178_v55, %s993_s18 }
 0x10c   : > { %462 = vrot.lane.b32.xlu1 %v1164_v50, %s994_s19 }
 0x10f   : > { %460 = vrot.lane.b32.xlu0 %v1178_v55, %s994_s19 }
 0x110   : > { %593 = vrot.lane.b32.xlu1 %v1124_v36, %s994_s19 }
 0x113   : > { %583 = vrot.lane.b32.xlu0 %v1202_v63, %s993_s18 }
 0x114   : > { %595 = vrot.lane.b32.xlu1 %v1142_v43, %s994_s19 }
 0x117   : > { %581 = vrot.lane.b32.xlu0 %v1210_v2, %s993_s18 }
 0x118   : > { %599 = vrot.lane.b32.xlu1 %v1202_v63, %s994_s19 }
 0x11b   : > { %597 = vrot.lane.b32.xlu0 %v1210_v2, %s994_s19 }
 0x15e   : > { %v508_v4 = vpop.permute.xlu1 %507 }
 0x15f   : > { %v518_v38 = vsel %vm451_vm3, 0.0, %v508_v4 }
 0x160   : > { %v542_v23 = vmul.f32 %v1231_v34, %v518_v38 }
 0x161   : > { %v442_v5 = vpop.permute.xlu0 %441 }
 0x162   : > { %v524_v11 = vpop.permute.xlu1 %523  ;;  %v453_v21 = vsel %vm451_vm3, 0.0, %v442_v5 }
 0x163   : > { %v478_v27 = vmul.f32 %v1221_v17, %v453_v21  ;;  %v534_v53 = vsel %vm468_vm4, %v524_v11, 0.0 }
 0x164   : > { %v566_v62 = vmul.f32 %v1240_v48, %v534_v53 }
 0x165   : > { %v440_v13 = vpop.permute.xlu0 %439  ;;  %v490_v41 = vadd.f32 %v486_v33, %v478_v27  ;;  %v553_v27 = vmul.f32 %v1236_v44, %v1084_v20 }
 0x166   : > { %v506_v15 = vpop.permute.xlu1 %505  ;;  %v452_v46 = vsel %vm451_vm3, 0.0, %v440_v13  ;;  %v626_v13 = vmul.f32 %v1246_v58, %v1142_v43  ;;  %v488_v43 = vmul.f32 %v1224_v24, %v1164_v50 }
 0x167   : > { %v477_v54 = vmul.f32 %v1221_v17, %v452_v46  ;;  %v517_v4 = vsel %vm451_vm3, 0.0, %v506_v15 }
 0x168   : > { %v541_v14 = vmul.f32 %v1231_v34, %v517_v4  ;;  %v556_v4 = vmul.f32 %v1236_v44, %v1106_v30 }
 0x169   : > { %v512_v22 = vpop.permute.xlu0 %511  ;;  %v489_v10 = vadd.f32 %v485_v61, %v477_v54 }
 0x16a   : > { %v522_v26 = vpop.permute.xlu1 %521 }
 0x16b   : > { %v533_v15 = vsel %vm468_vm4, %v522_v26, 0.0 }
 0x16d   : > { %v578_v32 = vpop.permute.xlu0 %577 }
 0x16e   : > { %v459_v37 = vpop.permute.xlu1 %458 }
 0x16f   : > { %v470_v40 = vsel %vm468_vm4, %v459_v37, 0.0  ;;  %v589_v37 = vsel %vm451_vm3, 0.0, %v578_v32  ;;  %v625_v32 = vmul.f32 %v1246_v58, %v1124_v36 }
 0x170   : > { %v498_v42 = vmul.f32 %v1227_v29, %v470_v40  ;;  %v520_v40 = vsel %vm451_vm3, 0.0, %v512_v22  ;;  %v487_v22 = vmul.f32 %v1224_v24, %v1178_v55 }
 0x171   : > { %v510_v47 = vpop.permute.xlu0 %509 }
 0x172   : > { %v502_v51 = vadd.f32 %v498_v42, %v490_v41  ;;  %v580_v52 = vpop.permute.xlu1 %579  ;;  %v565_v41 = vmul.f32 %v1240_v48, %v533_v15  ;;  %v519_v54 = vsel %vm451_vm3, 0.0, %v510_v47 }
 0x173   : > { %v590_v59 = vsel %vm451_vm3, 0.0, %v580_v52  ;;  %v544_v52 = vmul.f32 %v1231_v34, %v520_v40  ;;  %v543_v47 = vmul.f32 %v1231_v34, %v519_v54 }
 0x174   : > { %v546_v56 = vadd.f32 %v542_v23, %v502_v51  ;;  %v614_v11 = vmul.f32 %v1252_v0, %v590_v59  ;;  %v613_v23 = vmul.f32 %v1252_v0, %v589_v37 }
 0x175   : > { %v526_v60 = vpop.permute.xlu0 %525 }
 0x176   : > { %v558_v1 = vadd.f32 %v554_v57, %v546_v56  ;;  %v457_v3 = vpop.permute.xlu1 %456 }
 0x177   : > { %v469_v5 = vsel %vm468_vm4, %v457_v3, 0.0 }
 0x178   : > { %v570_v18 = vadd.f32 %v566_v62, %v558_v1  ;;  %v497_v12 = vmul.f32 %v1227_v29, %v469_v5 }
 0x179   : > { %v446_v28 = vpop.permute.xlu0 %445 }
 0x17a   : > { %v618_v16 = vadd.f32 %v614_v11, %v570_v18  ;;  %v501_v19 = vadd.f32 %v497_v12, %v489_v10  ;;  %v455_v21 = vsel %vm451_vm3, 0.0, %v446_v28  ;;  %v528_v25 = vpop.permute.xlu1 %527  ;;  %v535_v10 = vsel %vm468_vm4, %v526_v60, 0.0  ;;  %v851_v12 = vld [vmem:[%s1334_s4] ss:$0 sm:$0xff] }
 0x17b   : > { %v480_v33 = vmul.f32 %v1221_v17, %v455_v21  ;;  %v536_v62 = vsel %vm468_vm4, %v528_v25, 0.0  ;;  %v555_v60 = vmul.f32 %v1236_v44, %v1131_v39 }
 0x17c   : > { %v545_v31 = vadd.f32 %v541_v14, %v501_v19  ;;  %v630_v35 = vadd.f32 %v626_v13, %v618_v16 }
 0x17d   : > { %v444_v38 = vpop.permute.xlu0 %443  ;;  %v492_v49 = vadd.f32 %v488_v43, %v480_v33 }
 0x17e   : > { %v557_v42 = vadd.f32 %v553_v27, %v545_v31  ;;  %v454_v26 = vsel %vm451_vm3, 0.0, %v444_v38  ;;  %v463_v45 = vpop.permute.xlu1 %462  ;;  %v628_v27 = vmul.f32 %v1246_v58, %v1202_v63  ;;  %v567_v31 = vmul.f32 %v1240_v48, %v535_v10 }
 0x17f   : > { %v479_v20 = vmul.f32 %v1221_v17, %v454_v26  ;;  %v472_v46 = vsel %vm468_vm4, %v463_v45, 0.0  ;;  %v850_v17 = vld [vmem:[%s1333_s3 + $0x8] ss:$0 sm:$0xff]  ;;  %v627_v63 = vmul.f32 %v1246_v58, %v1210_v2  ;;  %v852_v2 = vld [vmem:[%s1336_s6] ss:$0 sm:$0xff] }
 0x180   : > { %v500_v50 = vmul.f32 %v1227_v29, %v472_v46  ;;  %v569_v51 = vadd.f32 %v565_v41, %v557_v42 }
 0x181   : > { %v461_v53 = vpop.permute.xlu0 %460  ;;  %v491_v36 = vadd.f32 %v487_v22, %v479_v20 }
 0x182   : > { %v504_v56 = vadd.f32 %v500_v50, %v492_v49  ;;  %v471_v57 = vsel %vm468_vm4, %v461_v53, 0.0  ;;  %v594_v59 = vpop.permute.xlu1 %593  ;;  %v617_v61 = vadd.f32 %v613_v23, %v569_v51 }
 0x183   : > { %v499_v1 = vmul.f32 %v1227_v29, %v471_v57  ;;  %v605_v55 = vsel %vm468_vm4, %v594_v59, 0.0  ;;  %v568_v29 = vmul.f32 %v1240_v48, %v536_v62 }
 0x184   : > { %v548_v24 = vadd.f32 %v544_v52, %v504_v56  ;;  %v637_v3 = vmul.f32 %v850_v17, %v605_v55  ;;  %v629_v5 = vadd.f32 %v625_v32, %v617_v61 }
 0x185   : > { %v503_v18 = vadd.f32 %v499_v1, %v491_v36  ;;  %v584_v11 = vpop.permute.xlu0 %583 }
 0x186   : > { %v560_v13 = vadd.f32 %v556_v4, %v548_v24  ;;  %v592_v28 = vsel %vm451_vm3, 0.0, %v584_v11  ;;  %v596_v14 = vpop.permute.xlu1 %595  ;;  %v641_v16 = vadd.f32 %v637_v3, %v629_v5 }
 0x187   : > { %v547_v19 = vadd.f32 %v543_v47, %v503_v18  ;;  %v616_v30 = vmul.f32 %v1252_v0, %v592_v28  ;;  %v606_v34 = vsel %vm468_vm4, %v596_v14, 0.0 }
 0x188   : > { %v572_v21 = vadd.f32 %v568_v29, %v560_v13  ;;  %v638_v25 = vmul.f32 %v850_v17, %v606_v34  ;;  %v652_v15 = vadd.f32 %v851_v12, %v641_v16 }
 0x189   : > { %v559_v33 = vadd.f32 %v555_v60, %v547_v19  ;;  %v582_v43 = vpop.permute.xlu0 %581 }
 0x18a   : > { %v620_v37 = vadd.f32 %v616_v30, %v572_v21  ;;  %v642_v38 = vadd.f32 %v638_v25, %v630_v35  ;;  %v591_v40 = vsel %vm451_vm3, 0.0, %v582_v43  ;;  %v600_v41 = vpop.permute.xlu1 %599  ;;  %v656_v42 = vmax.f32 %v652_v15, 0.0 }
 0x18b   : > { %v571_v26 = vadd.f32 %v567_v31, %v559_v33  ;;  %v615_v45 = vmul.f32 %v1252_v0, %v591_v40  ;;  %v608_v39 = vsel %vm468_vm4, %v600_v41, 0.0 }
 0x18c   : > { %v632_v44 = vadd.f32 %v628_v27, %v620_v37  ;;  %v640_v20 = vmul.f32 %v850_v17, %v608_v39  ;;  %v660_v46 = vmin.f32 %v656_v42, 6.0  ;;  %v653_v23 = vadd.f32 %v851_v12, %v642_v38 }
 0x18d   : > { %v619_v48 = vadd.f32 %v615_v45, %v571_v26  ;;  %v598_v49 = vpop.permute.xlu0 %597 }
 0x18e   : > { %v644_v50 = vadd.f32 %v640_v20, %v632_v44  ;;  %v607_v35 = vsel %vm468_vm4, %v598_v49, 0.0  ;;  %929 = vmatprep.mubr.f32.mxu1 %v660_v46  ;;  %v657_v51 = vmax.f32 %v653_v23, 0.0 }
 0x18f   : > { %v631_v32 = vadd.f32 %v627_v63, %v619_v48  ;;  %v639_v22 = vmul.f32 %v850_v17, %v607_v35 }
 0x190   : > { %v661_v52 = vmin.f32 %v657_v51, 6.0  ;;  %v655_v0 = vadd.f32 %v851_v12, %v644_v50 }
 0x191   : > { %v643_v53 = vadd.f32 %v639_v22, %v631_v32 }
 0x192   : > { %930 = vmatmul.mubr.f32.vlgmr.msra.gmra.mrb[0].mxu1 %v661_v52  ;;  %v659_v56 = vmax.f32 %v655_v0, 0.0 }
 0x193   : > { %v654_v54 = vadd.f32 %v851_v12, %v643_v53 }
 0x194   : > { %v663_v61 = vmin.f32 %v659_v56, 6.0 }
 0x195   : > { %v658_v57 = vmax.f32 %v654_v54, 0.0 }
 0x197   : > { %v662_v59 = vmin.f32 %v658_v57, 6.0 }
 0x199   : > { %932 = vmatprep.mubr.f32.mxu1 %v662_v59 }
 0x19a   : > { %933 = vmatmul.mubr.f32.gmra.mrb[2].mxu1 %v663_v61 }
 0x265   : > { %v931_v58 = vpop.f32.mrb[0].mxu1 }
 0x266   : > { %v759_v62 = vadd.f32 %v931_v58, %v852_v2  ;;  %v753_v36 = vpop.f32.mrb[1].mxu1 }
 0x267   : > { %v754_v17 = vadd.f32 %v852_v2, %v753_v36 }
 0x268   : > { %v773_v55 = vadd.f32 %v759_v62, %v1067_v7 }
 0x269   : > { %v772_v1 = vadd.f32 %v754_v17, %v1063_v6 }
 0x26a   : > { %777 = vst.msk [vmem:[%s280_s25 + $0x8] sm:$0xff] %vm297_vm0, %v773_v55 }
 0x26b   : > { %776 = vst.msk [vmem:[%s280_s25] sm:$0xff] %vm297_vm0, %v772_v1 }
 0x26d   : > { %v934_v24 = vpop.f32.mrb[2].mxu1 }
 0x26e   : > { %v769_v3 = vadd.f32 %v934_v24, %v852_v2  ;;  %v763_v4 = vpop.f32.mrb[3].mxu1 }
 0x26f   : > { %v764_v5 = vadd.f32 %v852_v2, %v763_v4 }
 0x270   : > { %v775_v10 = vadd.f32 %v769_v3, %v1075_v9 }
 0x271   : > { %v774_v47 = vadd.f32 %v764_v5, %v1069_v8 }
 0x272   : > { %779 = vst.msk [vmem:[%s280_s25 + $0x18] sm:$0xff] %vm297_vm0, %v775_v10 }
 0x273   : > { %778 = vst.msk [vmem:[%s280_s25 + $0x10] sm:$0xff] %vm297_vm0, %v774_v47 }
 0x274 PF: > { %s17_s24 = sadd.s32 1, %s991_s24  }
 0x275   : > { %p14_p4 = scmp.ge.s32.totalorder %s17_s24, 4  }
 0x277   :  { %16 = sbr.rel (!%p14_p4) target bundleno = 1 (0x1), region = 78 }

</bundles_post_ra>
